<compile_context>
chip_gen: v6e
topology: v6e:2x2x1
jax: 0.10.0
libtpu: 0.0.40
codegen_flags: <defaults>
</compile_context>

<pallas_src>
import functools

import jax
import jax.numpy as jnp
from jax import lax
from jax.experimental import pallas as pl
from jax.experimental.pallas import tpu as pltpu


def _affine_grid_kernel(theta_ref, out_ref, *, H, W):
    """Writes one (Bt, St) tile of the flattened, channel-interleaved grid.

    theta_ref: (Bt, 6) VMEM  -- rows are [t00, t01, t02, t10, t11, t12]
    out_ref:   (Bt, St) VMEM -- flat index i = (h*W + w)*2 + c  (c=0: x, c=1: y)
    """
    _, St = out_ref.shape
    si = pl.program_id(1)

    # ---- batch-independent base grid for this spatial tile (amortized over Bt)
    l = lax.broadcasted_iota(jnp.int32, (1, St), dimension=1)
    g = l + si * St                       # global flat index
    # St is always even, so channel parity comes from the local iota.
    is_x = (l & 1) == 0                   # (1, St) bool: True -> x channel

    g_f = g.astype(jnp.float32)
    pix_f = jnp.floor(g_f * 0.5)          # pixel index = h*W + w (exact in f32)

    inv_w = 1.0 / W
    inv_h = 1.0 / H
    # h = pix // W, w = pix % W without vector integer division:
    # float reciprocal-divide + floor, then an off-by-one guard (exact for
    # any realistic grid size, H*W < ~8M).
    h_f = jnp.floor((pix_f + 0.5) * inv_w)
    w_f = pix_f - h_f * W
    h_f = h_f + jnp.where(w_f >= W, 1.0, 0.0) - jnp.where(w_f < 0.0, 1.0, 0.0)
    w_f = pix_f - h_f * W

    # align_corners=False normalization.
    xw = (2.0 * w_f + 1.0) * inv_w - 1.0  # (1, St)
    yh = (2.0 * h_f + 1.0) * inv_h - 1.0  # (1, St)

    # ---- per-batch affine coefficients, selected per interleaved channel ----
    t00 = theta_ref[:, 0:1]
    t01 = theta_ref[:, 1:2]
    t02 = theta_ref[:, 2:3]
    t10 = theta_ref[:, 3:4]
    t11 = theta_ref[:, 4:5]
    t12 = theta_ref[:, 5:6]

    c0 = jnp.where(is_x, t00, t10)        # (Bt, St)
    c1 = jnp.where(is_x, t01, t11)
    c2 = jnp.where(is_x, t02, t12)

    out_ref[...] = c0 * xw + c1 * yh + c2


def affine_grid_gen(theta, out_h=240, out_w=240, out_ch=3):
    """Pallas equivalent of AffineGridGen(out_h, out_w, out_ch)(theta).

    theta: (B, 2, 3) float32
    returns: (B, out_h, out_w, 2) float32
    """
    del out_ch  # only changes the torch.Size passed to affine_grid, not the output
    theta = jnp.asarray(theta, jnp.float32)
    B = int(theta.shape[0])
    H, W = int(out_h), int(out_w)
    HW2 = H * W * 2

    # --- batch tiling: many batch rows per grid step -------------------------
    if B <= 8:
        Bt = B                      # block equals the full batch dim
    else:
        Bt = 8                      # multiple of 8 sublanes
    n_b = pl.cdiv(B, Bt)
    B_pad = n_b * Bt

    theta_flat = theta.reshape(B, 6)
    if B_pad != B:
        theta_flat = jnp.concatenate(
            [theta_flat, jnp.zeros((B_pad - B, 6), jnp.float32)], axis=0)

    # --- spatial tiling over the flattened (h, w, channel) axis --------------
    # Lane-dense last dim; cap the per-step output block at ~1 MiB so the
    # pipeline (double-buffered) stays comfortably inside VMEM on v5e/v6e/v7x.
    max_block_elems = (1024 * 1024) // 4
    st_cap = max(128, (max_block_elems // Bt) // 128 * 128)
    St = HW2 if HW2 <= st_cap else st_cap       # St is always even
    n_s = pl.cdiv(HW2, St)

    kernel = functools.partial(_affine_grid_kernel, H=H, W=W)

    out_flat = pl.pallas_call(
        kernel,
        out_shape=jax.ShapeDtypeStruct((B_pad, HW2), jnp.float32),
        grid_spec=pltpu.PrefetchScalarGridSpec(
            num_scalar_prefetch=0,
            grid=(n_b, n_s),
            in_specs=[pl.BlockSpec((Bt, 6), lambda bi, si: (bi, 0))],
            out_specs=pl.BlockSpec((Bt, St), lambda bi, si: (bi, si)),
        ),
        compiler_params=pltpu.CompilerParams(
            dimension_semantics=("parallel", "parallel"),
            vmem_limit_bytes=32 * 1024 * 1024,
        ),
    )(theta_flat)

    # Metadata-only reshape: flat index = (h*W + w)*2 + c  -> (B, H, W, 2).
    return out_flat[:B].reshape(B, H, W, 2)


def _reference_affine_grid(theta, H, W):
    # Pure-JAX reference (align_corners=False), for verification.
    xs = (2.0 * jnp.arange(W, dtype=jnp.float32) + 1.0) / W - 1.0
    ys = (2.0 * jnp.arange(H, dtype=jnp.float32) + 1.0) / H - 1.0
    X, Y = jnp.meshgrid(xs, ys)                          # (H, W) each
    base = jnp.stack([X, Y, jnp.ones_like(X)], axis=-1)  # (H, W, 3)
    return jnp.einsum("bij,hwj->bhwi", theta, base)      # (B, H, W, 2)


if __name__ == "__main__":
    key = jax.random.PRNGKey(0)

    # Primary small case: batch=2, 16x16 output grid.
    theta = jax.random.normal(key, (2, 2, 3), dtype=jnp.float32)
    out = jax.block_until_ready(affine_grid_gen(theta, out_h=16, out_w=16, out_ch=3))
    ref = _reference_affine_grid(theta, 16, 16)
    assert out.shape == (2, 16, 16, 2)
    assert jnp.allclose(out, ref, atol=1e-5, rtol=1e-5)

    # Second case: non-power-of-two W, B > 8 (exercises batch blocking + padding).
    theta2 = jax.random.normal(jax.random.PRNGKey(0), (10, 2, 3), dtype=jnp.float32)
    out2 = jax.block_until_ready(affine_grid_gen(theta2, out_h=24, out_w=20, out_ch=3))
    ref2 = _reference_affine_grid(theta2, 24, 20)
    assert out2.shape == (10, 24, 20, 2)
    assert jnp.allclose(out2, ref2, atol=1e-5, rtol=1e-5)

    print("KERNEL_OK")
</pallas_src>

<mosaic_0001>
module attributes {stable_mosaic.version = 11 : i64} {
  func.func @_affine_grid_kernel(%arg0: i32, %arg1: i32, %arg2: memref<2x6xf32, #tpu.memory_space<vmem>>, %arg3: memref<2x512xf32, #tpu.memory_space<vmem>>) attributes {dimension_semantics = [#tpu.dimension_semantics<parallel>, #tpu.dimension_semantics<parallel>], iteration_bounds = array<i64: 1, 1>, scalar_prefetch = 0 : i64, scratch_operands = 0 : i64, tpu.core_type = #tpu.core_type<tc>, window_params = [{transform_indices = @transform_0, window_bounds = array<i64: 2, 6>}, {transform_indices = @transform_1, window_bounds = array<i64: 2, 512>}]} {
    %0 = tpu.iota {dimensions = array<i32: 1>} : vector<1x512xi32>
    %c512_i32 = arith.constant 512 : i32
    %1 = arith.muli %arg1, %c512_i32 : i32
    %2 = vector.broadcast %1 : i32 to vector<1x512xi32>
    %3 = arith.addi %0, %2 : vector<1x512xi32>
    %c1_i32 = arith.constant 1 : i32
    %4 = vector.broadcast %c1_i32 : i32 to vector<1x512xi32>
    %5 = arith.andi %0, %4 : vector<1x512xi32>
    %c0_i32 = arith.constant 0 : i32
    %6 = vector.broadcast %c0_i32 : i32 to vector<1x512xi32>
    %7 = arith.cmpi eq, %5, %6 : vector<1x512xi32>
    %8 = arith.sitofp %3 : vector<1x512xi32> to vector<1x512xf32>
    %cst = arith.constant 5.000000e-01 : f32
    %9 = vector.broadcast %cst : f32 to vector<1x512xf32>
    %10 = arith.mulf %8, %9 : vector<1x512xf32>
    %11 = math.floor %10 : vector<1x512xf32>
    %cst_0 = arith.constant 5.000000e-01 : f32
    %12 = vector.broadcast %cst_0 : f32 to vector<1x512xf32>
    %13 = arith.addf %11, %12 : vector<1x512xf32>
    %cst_1 = arith.constant 6.250000e-02 : f32
    %14 = vector.broadcast %cst_1 : f32 to vector<1x512xf32>
    %15 = arith.mulf %13, %14 : vector<1x512xf32>
    %16 = math.floor %15 : vector<1x512xf32>
    %cst_2 = arith.constant 1.600000e+01 : f32
    %17 = vector.broadcast %cst_2 : f32 to vector<1x512xf32>
    %18 = arith.mulf %16, %17 : vector<1x512xf32>
    %19 = arith.subf %11, %18 : vector<1x512xf32>
    %cst_3 = arith.constant 1.600000e+01 : f32
    %20 = vector.broadcast %cst_3 : f32 to vector<1x512xf32>
    %21 = arith.cmpf oge, %19, %20 : vector<1x512xf32>
    %cst_4 = arith.constant 1.000000e+00 : f32
    %cst_5 = arith.constant 0.000000e+00 : f32
    %22 = vector.broadcast %cst_4 : f32 to vector<1x512xf32>
    %23 = vector.broadcast %cst_5 : f32 to vector<1x512xf32>
    %24 = arith.select %21, %22, %23 : vector<1x512xi1>, vector<1x512xf32>
    %25 = arith.addf %16, %24 : vector<1x512xf32>
    %cst_6 = arith.constant 0.000000e+00 : f32
    %26 = vector.broadcast %cst_6 : f32 to vector<1x512xf32>
    %27 = arith.cmpf olt, %19, %26 : vector<1x512xf32>
    %cst_7 = arith.constant 1.000000e+00 : f32
    %cst_8 = arith.constant 0.000000e+00 : f32
    %28 = vector.broadcast %cst_7 : f32 to vector<1x512xf32>
    %29 = vector.broadcast %cst_8 : f32 to vector<1x512xf32>
    %30 = arith.select %27, %28, %29 : vector<1x512xi1>, vector<1x512xf32>
    %31 = arith.subf %25, %30 : vector<1x512xf32>
    %cst_9 = arith.constant 1.600000e+01 : f32
    %32 = vector.broadcast %cst_9 : f32 to vector<1x512xf32>
    %33 = arith.mulf %31, %32 : vector<1x512xf32>
    %34 = arith.subf %11, %33 : vector<1x512xf32>
    %cst_10 = arith.constant 2.000000e+00 : f32
    %35 = vector.broadcast %cst_10 : f32 to vector<1x512xf32>
    %36 = arith.mulf %35, %34 : vector<1x512xf32>
    %cst_11 = arith.constant 1.000000e+00 : f32
    %37 = vector.broadcast %cst_11 : f32 to vector<1x512xf32>
    %38 = arith.addf %36, %37 : vector<1x512xf32>
    %cst_12 = arith.constant 6.250000e-02 : f32
    %39 = vector.broadcast %cst_12 : f32 to vector<1x512xf32>
    %40 = arith.mulf %38, %39 : vector<1x512xf32>
    %cst_13 = arith.constant 1.000000e+00 : f32
    %41 = vector.broadcast %cst_13 : f32 to vector<1x512xf32>
    %42 = arith.subf %40, %41 : vector<1x512xf32>
    %cst_14 = arith.constant 2.000000e+00 : f32
    %43 = vector.broadcast %cst_14 : f32 to vector<1x512xf32>
    %44 = arith.mulf %43, %31 : vector<1x512xf32>
    %cst_15 = arith.constant 1.000000e+00 : f32
    %45 = vector.broadcast %cst_15 : f32 to vector<1x512xf32>
    %46 = arith.addf %44, %45 : vector<1x512xf32>
    %cst_16 = arith.constant 6.250000e-02 : f32
    %47 = vector.broadcast %cst_16 : f32 to vector<1x512xf32>
    %48 = arith.mulf %46, %47 : vector<1x512xf32>
    %cst_17 = arith.constant 1.000000e+00 : f32
    %49 = vector.broadcast %cst_17 : f32 to vector<1x512xf32>
    %50 = arith.subf %48, %49 : vector<1x512xf32>
    %c0 = arith.constant 0 : index
    %c0_18 = arith.constant 0 : index
    %51 = vector.load %arg2[%c0, %c0_18] : memref<2x6xf32, #tpu.memory_space<vmem>>, vector<2x1xf32>
    %c0_19 = arith.constant 0 : index
    %c1 = arith.constant 1 : index
    %52 = vector.load %arg2[%c0_19, %c1] : memref<2x6xf32, #tpu.memory_space<vmem>>, vector<2x1xf32>
    %c0_20 = arith.constant 0 : index
    %c2 = arith.constant 2 : index
    %53 = vector.load %arg2[%c0_20, %c2] : memref<2x6xf32, #tpu.memory_space<vmem>>, vector<2x1xf32>
    %c0_21 = arith.constant 0 : index
    %c3 = arith.constant 3 : index
    %54 = vector.load %arg2[%c0_21, %c3] : memref<2x6xf32, #tpu.memory_space<vmem>>, vector<2x1xf32>
    %c0_22 = arith.constant 0 : index
    %c4 = arith.constant 4 : index
    %55 = vector.load %arg2[%c0_22, %c4] : memref<2x6xf32, #tpu.memory_space<vmem>>, vector<2x1xf32>
    %c0_23 = arith.constant 0 : index
    %c5 = arith.constant 5 : index
    %56 = vector.load %arg2[%c0_23, %c5] : memref<2x6xf32, #tpu.memory_space<vmem>>, vector<2x1xf32>
    %57 = vector.shape_cast %7 : vector<1x512xi1> to vector<1x512xi1>
    %58 = vector.broadcast %57 : vector<1x512xi1> to vector<2x512xi1>
    %59 = vector.shape_cast %51 : vector<2x1xf32> to vector<2x1xf32>
    %60 = vector.broadcast %59 : vector<2x1xf32> to vector<2x512xf32>
    %61 = vector.shape_cast %54 : vector<2x1xf32> to vector<2x1xf32>
    %62 = vector.broadcast %61 : vector<2x1xf32> to vector<2x512xf32>
    %63 = arith.select %58, %60, %62 : vector<2x512xi1>, vector<2x512xf32>
    %64 = vector.shape_cast %7 : vector<1x512xi1> to vector<1x512xi1>
    %65 = vector.broadcast %64 : vector<1x512xi1> to vector<2x512xi1>
    %66 = vector.shape_cast %52 : vector<2x1xf32> to vector<2x1xf32>
    %67 = vector.broadcast %66 : vector<2x1xf32> to vector<2x512xf32>
    %68 = vector.shape_cast %55 : vector<2x1xf32> to vector<2x1xf32>
    %69 = vector.broadcast %68 : vector<2x1xf32> to vector<2x512xf32>
    %70 = arith.select %65, %67, %69 : vector<2x512xi1>, vector<2x512xf32>
    %71 = vector.shape_cast %7 : vector<1x512xi1> to vector<1x512xi1>
    %72 = vector.broadcast %71 : vector<1x512xi1> to vector<2x512xi1>
    %73 = vector.shape_cast %53 : vector<2x1xf32> to vector<2x1xf32>
    %74 = vector.broadcast %73 : vector<2x1xf32> to vector<2x512xf32>
    %75 = vector.shape_cast %56 : vector<2x1xf32> to vector<2x1xf32>
    %76 = vector.broadcast %75 : vector<2x1xf32> to vector<2x512xf32>
    %77 = arith.select %72, %74, %76 : vector<2x512xi1>, vector<2x512xf32>
    %78 = vector.broadcast %42 : vector<1x512xf32> to vector<2x512xf32>
    %79 = arith.mulf %63, %78 : vector<2x512xf32>
    %80 = vector.broadcast %50 : vector<1x512xf32> to vector<2x512xf32>
    %81 = arith.mulf %70, %80 : vector<2x512xf32>
    %82 = arith.addf %79, %81 : vector<2x512xf32>
    %83 = arith.addf %82, %77 : vector<2x512xf32>
    %c0_24 = arith.constant 0 : index
    %c0_25 = arith.constant 0 : index
    %84 = vector.load %arg3[%c0_24, %c0_25] : memref<2x512xf32, #tpu.memory_space<vmem>>, vector<2x512xf32>
    tpu.vector_store %arg3[%c0_24, %c0_25], %83 {strides = array<i32>} : memref<2x512xf32, #tpu.memory_space<vmem>>, vector<2x512xf32>,
    return
  }
  func.func @transform_0(%arg0: i32, %arg1: i32) -> (i32, i32) {
    %c0_i32 = arith.constant 0 : i32
    %c0_i32_0 = arith.constant 0 : i32
    return %arg0, %c0_i32 : i32, i32
  }
  func.func @transform_1(%arg0: i32, %arg1: i32) -> (i32, i32) {
    %c0_i32 = arith.constant 0 : i32
    return %arg0, %arg1 : i32, i32
  }
}

</mosaic_0001>

<bundles_post_ra>
// kernel: tpu_custom_call.1
= control target key start
LH: loop header
LB: loop body
LE: loop exit
PB: predicated region body
PF: predicated region fallthrough
CT: control target
= control target key end

     0   :  { %6 = vsyncpa [#allocation3], 0  ;;  %s391_s0 = inlined_call_operand.hbm [shape: f32[2,6], index: 0, kind: input, shape index: {}]   ;;  %s392_s1 = inlined_call_operand.hbm [shape: f32[2,512], index: 1, kind: output, shape index: {}]  }
   0x1   :  { %7 = vsyncpa [#allocation4], 0  ;;  %s304_s6 = smov [#allocation2]  }
   0x2   :  { %s14_s7 = sshll.u32 %s304_s6, 4  ;;  %s15_s7 = int_to_ptr.vmem [resolvable:$true] %s14_s7 }
   0x3   :  { %s268_s8 = scalar_lea.vmem %s15_s7, 32  ;;  %p273_p1 = scmp.lt.s32.totalorder %s15_s7, %s15_s7 }
   0x4   :  { %p269_p0 = scmp.ne.s32.totalorder %s15_s7, %s268_s8  ;;  %p274_p2 = scmp.lt.s32.totalorder %s268_s8, %s268_s8 }
   0x6   :  { %p275_p3 = por %p274_p2, %p273_p1 }
   0x8   :  { %p276_p4 = pnand %p275_p3, %p269_p0 }
   0xa   :  { %279 = shalt.err (!%p276_p4)
}
   0xb   :  { %17 = dma.hbm_to_vmem [thread:$0]  %s391_s0, 32, %s15_s7, [#allocation3]  }
   0xc   :  { %300 = dma.done.wait [#allocation3], 32  }
   0xd   :  { %301 = vsyncadd [#allocation3], 4294967264  ;;  %v305_v0 = vmov 1   ;;  %v306_v1 = vmov 0   ;;  %v136_v2 = vld [vmem:[#allocation2] sm:$0x3]  ;;  %v21_v7 = vlaneseq }
   0xe   :  { %256 = vset.pattern.permute.xlu1 %v305_v0  ;;  %254 = vset.pattern.permute.xlu0 %v306_v1  ;;  %v307_v3 = vmov 4   ;;  %v308_v4 = vmov 3   ;;  %v309_v5 = vmov 2   ;;  %v310_v6 = vmov 5   ;;  %s313_s0 = smov [#allocation5]  }
   0xf   :  { %159 = vperm.xlu1 %256, %v136_v2   ;;  %147 = vperm.xlu0 %254, %v136_v2   ;;  %v328_v8 = vand.u32 127, %v21_v7  ;;  %v311_v44 = vmov 0.0   ;;  %s227_s11 = sshll.u32 %s313_s0, 4  ;;  %s228_s11 = int_to_ptr.vmem [resolvable:$true] %s227_s11 }
  0x10   :  { %s280_s12 = scalar_lea.vmem %s228_s11, 128  ;;  %p285_p6 = scmp.lt.s32.totalorder %s228_s11, %s228_s11 }
  0x11   :  { %v331_v9 = vadd.s32 128, %v328_v8  ;;  %v334_v10 = vadd.s32 256, %v328_v8  ;;  %v337_v11 = vadd.s32 384, %v328_v8  ;;  %v40_v12 = vcvt.s32.f32 %v328_v8  ;;  %p281_p5 = scmp.ne.s32.totalorder %s228_s11, %s280_s12  ;;  %p286_p7 = scmp.lt.s32.totalorder %s280_s12, %s280_s12 }
  0x13   :  { %257 = vset.pattern.permute.xlu1 %v307_v3  ;;  %255 = vset.pattern.permute.xlu0 %v308_v4  ;;  %v41_v13 = vcvt.s32.f32 %v331_v9  ;;  %v42_v14 = vcvt.s32.f32 %v334_v10  ;;  %v43_v15 = vcvt.s32.f32 %v337_v11  ;;  %v44_v16 = vmul.f32 0.5, %v40_v12  ;;  %p287_p8 = por %p286_p7, %p285_p6 }
  0x14   :  { %163 = vperm.xlu1 %257, %v136_v2   ;;  %151 = vperm.xlu0 %255, %v136_v2  }
  0x15   :  { %v45_v17 = vmul.f32 0.5, %v41_v13  ;;  %v46_v18 = vmul.f32 0.5, %v42_v14  ;;  %v47_v19 = vmul.f32 0.5, %v43_v15  ;;  %v48_v20 = vfloor.f32 %v44_v16  ;;  %p288_p9 = pnand %p287_p8, %p281_p5 }
  0x17   :  { %v49_v21 = vfloor.f32 %v45_v17  ;;  %v50_v22 = vfloor.f32 %v46_v18  ;;  %v51_v23 = vfloor.f32 %v47_v19  ;;  %v52_v24 = vadd.f32 0.5, %v48_v20 }
  0x18   :  { %258 = vset.pattern.permute.xlu1 %v309_v5  ;;  %259 = vset.pattern.permute.xlu0 %v310_v6 }
  0x19   :  { %171 = vperm.xlu1 %258, %v136_v2   ;;  %175 = vperm.xlu0 %259, %v136_v2   ;;  %v53_v25 = vadd.f32 0.5, %v49_v21  ;;  %v54_v26 = vadd.f32 0.5, %v50_v22  ;;  %v55_v27 = vadd.f32 0.5, %v51_v23  ;;  %v56_v28 = vmul.f32 0.0625, %v52_v24 }
  0x1b   :  { %v57_v29 = vmul.f32 0.0625, %v53_v25  ;;  %v58_v30 = vmul.f32 0.0625, %v54_v26  ;;  %v59_v31 = vmul.f32 0.0625, %v55_v27  ;;  %v60_v32 = vfloor.f32 %v56_v28 }
  0x1d   :  { %v61_v33 = vfloor.f32 %v57_v29  ;;  %v62_v34 = vfloor.f32 %v58_v30  ;;  %v63_v35 = vfloor.f32 %v59_v31  ;;  %v64_v36 = vmul.f32 16.0, %v60_v32 }
  0x1f   :  { %v65_v37 = vmul.f32 16.0, %v61_v33  ;;  %v66_v38 = vmul.f32 16.0, %v62_v34  ;;  %v67_v39 = vmul.f32 16.0, %v63_v35  ;;  %v68_v40 = vsub.f32 %v48_v20, %v64_v36 }
  0x20   :  { %v312_v36 = vmov 1983009808  }
  0x21   :  { %v69_v41 = vsub.f32 %v49_v21, %v65_v37  ;;  %v70_v42 = vsub.f32 %v50_v22, %v66_v38  ;;  %v71_v43 = vsub.f32 %v51_v23, %v67_v39  ;;  %vm72_vm0 = vcmp.ge.f32.partialorder %v68_v40, 16.0 }
  0x22   :  { %v76_v45 = vsel %vm72_vm0, 1.0, %v311_v44  ;;  %vm84_vm4 = vcmp.lt.f32.partialorder %v68_v40, 0.0  ;;  %v205_v37 = vunpack.c.l.s4 %v312_v36 }
  0x23   :  { %vm73_vm1 = vcmp.ge.f32.partialorder %v69_v41, 16.0  ;;  %vm74_vm2 = vcmp.ge.f32.partialorder %v70_v42, 16.0  ;;  %vm75_vm3 = vcmp.ge.f32.partialorder %v71_v43, 16.0  ;;  %vm85_vm5 = vcmp.lt.f32.partialorder %v69_v41, 0.0 }
  0x24   :  { %v77_v46 = vsel %vm73_vm1, 1.0, %v311_v44  ;;  %v78_v47 = vsel %vm74_vm2, 1.0, %v311_v44  ;;  %v79_v48 = vsel %vm75_vm3, 1.0, %v311_v44  ;;  %vm86_vm6 = vcmp.lt.f32.partialorder %v70_v42, 0.0 }
  0x25   :  { %vm87_vm7 = vcmp.lt.f32.partialorder %v71_v43, 0.0  ;;  %v80_v49 = vadd.f32 %v76_v45, %v60_v32  ;;  %v81_v50 = vadd.f32 %v77_v46, %v61_v33  ;;  %v82_v51 = vadd.f32 %v78_v47, %v62_v34 }
  0x26   :  { %v83_v52 = vadd.f32 %v79_v48, %v63_v35  ;;  %v88_v53 = vsel %vm84_vm4, 1.0, %v311_v44  ;;  %v89_v54 = vsel %vm85_vm5, 1.0, %v311_v44  ;;  %v90_v55 = vsel %vm86_vm6, 1.0, %v311_v44 }
  0x27   :  { %v91_v56 = vsel %vm87_vm7, 1.0, %v311_v44  ;;  %v92_v57 = vsub.f32 %v80_v49, %v88_v53  ;;  %v93_v58 = vsub.f32 %v81_v50, %v89_v54  ;;  %v94_v59 = vsub.f32 %v82_v51, %v90_v55 }
  0x28   :  { %v95_v60 = vsub.f32 %v83_v52, %v91_v56  ;;  %v206_v46 = vunpack.c.0.s8 %v205_v37  ;;  %v208_v47 = vshrl.u32 %v21_v7, 7 }
  0x29   :  { %v96_v61 = vmul.f32 16.0, %v92_v57  ;;  %v97_v62 = vmul.f32 16.0, %v93_v58  ;;  %v98_v63 = vmul.f32 16.0, %v94_v59  ;;  %v120_v5 = vmul.f32 2.0, %v92_v57 }
  0x2a   :  { %v99_v0 = vmul.f32 16.0, %v95_v60  ;;  %v121_v6 = vmul.f32 2.0, %v93_v58  ;;  %v122_v12 = vmul.f32 2.0, %v94_v59  ;;  %v123_v13 = vmul.f32 2.0, %v95_v60 }
  0x2b   :  { %v100_v1 = vsub.f32 %v48_v20, %v96_v61  ;;  %v101_v2 = vsub.f32 %v49_v21, %v97_v62  ;;  %v102_v3 = vsub.f32 %v50_v22, %v98_v63  ;;  %v124_v18 = vadd.f32 1.0, %v120_v5 }
  0x2c   :  { %v103_v4 = vsub.f32 %v51_v23, %v99_v0  ;;  %v125_v19 = vadd.f32 1.0, %v121_v6  ;;  %v126_v24 = vadd.f32 1.0, %v122_v12  ;;  %v127_v25 = vadd.f32 1.0, %v123_v13 }
  0x2d   :  { %v104_v14 = vmul.f32 2.0, %v100_v1  ;;  %v105_v15 = vmul.f32 2.0, %v101_v2  ;;  %v106_v16 = vmul.f32 2.0, %v102_v3  ;;  %v32_v20 = vand.u32 1, %v328_v8 }
  0x2e   :  { %v107_v17 = vmul.f32 2.0, %v103_v4  ;;  %v33_v21 = vand.u32 1, %v331_v9  ;;  %v34_v22 = vand.u32 1, %v334_v10  ;;  %v35_v23 = vand.u32 1, %v337_v11 }
  0x2f   :  { %v108_v26 = vadd.f32 1.0, %v104_v14  ;;  %v109_v27 = vadd.f32 1.0, %v105_v15  ;;  %v110_v28 = vadd.f32 1.0, %v106_v16  ;;  %v128_v30 = vmul.f32 0.0625, %v124_v18 }
  0x30   :  { %v111_v29 = vadd.f32 1.0, %v107_v17  ;;  %v129_v31 = vmul.f32 0.0625, %v125_v19  ;;  %v130_v32 = vmul.f32 0.0625, %v126_v24  ;;  %v131_v33 = vmul.f32 0.0625, %v127_v25 }
  0x31   :  { %v112_v38 = vmul.f32 0.0625, %v108_v26  ;;  %v113_v39 = vmul.f32 0.0625, %v109_v27  ;;  %v114_v40 = vmul.f32 0.0625, %v110_v28  ;;  %vm347_vm8 = vcmp.eq.s32.totalorder %v32_v20, 0 }
  0x32   :  { %v115_v41 = vmul.f32 0.0625, %v111_v29  ;;  %vm351_vm9 = vcmp.eq.s32.totalorder %v33_v21, 0  ;;  %vm355_vm10 = vcmp.eq.s32.totalorder %v34_v22, 0  ;;  %vm359_vm11 = vcmp.eq.s32.totalorder %v35_v23, 0 }
  0x33   :  { %v240_v42 = vadd.f32 -1.0, %v128_v30  ;;  %v241_v43 = vadd.f32 -1.0, %v129_v31  ;;  %v242_v44 = vadd.f32 -1.0, %v130_v32  ;;  %v243_v45 = vadd.f32 -1.0, %v131_v33 }
  0x34   :  { %v236_v49 = vadd.f32 -1.0, %v112_v38  ;;  %v237_v50 = vadd.f32 -1.0, %v113_v39  ;;  %v238_v51 = vadd.f32 -1.0, %v114_v40  ;;  %v239_v52 = vadd.f32 -1.0, %v115_v41 }
  0x35   :  { %v209_v12 = vsub.s32 %v206_v46, %v208_v47 }
  0x8a   :  { %v160_v34 = vpop.permute.xlu1 %159  ;;  %v148_v35 = vpop.permute.xlu0 %147 }
  0x8f   :  { %v164_v48 = vpop.permute.xlu1 %163  ;;  %v152_v53 = vpop.permute.xlu0 %151 }
  0x90   :  { %v166_v54 = vsel %vm347_vm8, %v160_v34, %v164_v48  ;;  %v167_v55 = vsel %vm351_vm9, %v160_v34, %v164_v48  ;;  %v168_v56 = vsel %vm355_vm10, %v160_v34, %v164_v48  ;;  %v169_v57 = vsel %vm359_vm11, %v160_v34, %v164_v48 }
  0x91   :  { %v186_v58 = vmul.f32 %v240_v42, %v166_v54  ;;  %v187_v7 = vmul.f32 %v241_v43, %v167_v55  ;;  %v188_v59 = vmul.f32 %v242_v44, %v168_v56  ;;  %v189_v60 = vmul.f32 %v243_v45, %v169_v57 }
  0x92   :  { %v154_v61 = vsel %vm347_vm8, %v148_v35, %v152_v53  ;;  %v155_v62 = vsel %vm351_vm9, %v148_v35, %v152_v53  ;;  %v156_v63 = vsel %vm355_vm10, %v148_v35, %v152_v53  ;;  %v157_v0 = vsel %vm359_vm11, %v148_v35, %v152_v53 }
  0x93   :  { %v182_v1 = vmul.f32 %v236_v49, %v154_v61  ;;  %v183_v2 = vmul.f32 %v237_v50, %v155_v62  ;;  %v184_v3 = vmul.f32 %v238_v51, %v156_v63  ;;  %v185_v4 = vmul.f32 %v239_v52, %v157_v0 }
  0x94   :  { %v172_v5 = vpop.permute.xlu1 %171  ;;  %v176_v6 = vpop.permute.xlu0 %175 }
  0x95   :  { %v190_v13 = vadd.f32 %v186_v58, %v182_v1  ;;  %v191_v14 = vadd.f32 %v187_v7, %v183_v2  ;;  %v192_v15 = vadd.f32 %v188_v59, %v184_v3  ;;  %v193_v16 = vadd.f32 %v189_v60, %v185_v4 }
  0x96   :  { %v178_v17 = vsel %vm347_vm8, %v172_v5, %v176_v6  ;;  %v179_v18 = vsel %vm351_vm9, %v172_v5, %v176_v6  ;;  %v180_v19 = vsel %vm355_vm10, %v172_v5, %v176_v6  ;;  %v181_v24 = vsel %vm359_vm11, %v172_v5, %v176_v6 }
  0x97   :  { %v194_v25 = vadd.f32 %v190_v13, %v178_v17  ;;  %v195_v26 = vadd.f32 %v191_v14, %v179_v18  ;;  %v196_v27 = vadd.f32 %v192_v15, %v180_v19  ;;  %v197_v28 = vadd.f32 %v193_v16, %v181_v24 }
  0x99   :  { %v202_v29 = vcombine.low %v194_v25, %v195_v26  ;;  %v203_v20 = vcombine.low %v196_v27, %v197_v28 }
  0x9b   :  { %v210_v21 = vrot.slane %v202_v29, %v209_v12  ;;  %v217_v22 = vrot.slane %v203_v20, %v209_v12 }
  0x9d   :  { %v218_v23 = vcombine.low %v210_v21, %v217_v22 }
  0x9f   :  { %220 = vst [vmem:[#allocation5] sm:$0xff] %v218_v23 }
  0xa0   :  { %291 = shalt.err (!%p288_p9)
}
  0xa1   :  { %230 = dma.vmem_to_hbm [thread:$0]  %s228_s11, 128, %s392_s1, [#allocation4]  }
  0xa2   :  { %302 = dma.done.wait [#allocation4], 128  }
  0xa3   :  { %303 = vsyncadd [#allocation4], 4294967168 }
  0xa4   :  { %234 = vsyncpa [#allocation3], 1 }
  0xa5   :  { %235 = vsyncpa [#allocation4], 1 }

</bundles_post_ra>
